<compile_context>
chip_gen: v7x
topology: tpu7x:2x2x1
jax: 0.10.0
libtpu: 0.0.40
codegen_flags: <defaults>
</compile_context>

<pallas_src>
import jax
import jax.numpy as jnp
from jax.experimental import pallas as pl
from jax.experimental.pallas import tpu as pltpu


def _alias_touch_kernel(x_hbm, o_hbm):
    # Output aliases the input buffer, so the data is already in place.  The
    # only job is to pin a fake read+write dependency on the aliased output so
    # it counts as materialized.  No DMA is ever issued.
    del x_hbm
    pltpu.touch(o_hbm)


def _dma_copy_kernel(x_hbm, o_hbm, sem):
    # Fallback: one HBM->HBM DMA of the whole array.  Skips the
    # HBM->VMEM->vreg->VMEM->HBM round trip, has no grid (no ~0.35us/step
    # overhead) and near-zero VMEM use, so a pure copy stays at HBM roofline.
    cp = pltpu.make_async_copy(x_hbm, o_hbm, sem)
    cp.start()
    cp.wait()


def _flatten_alias_call(x2d):
    return pl.pallas_call(
        _alias_touch_kernel,
        out_shape=jax.ShapeDtypeStruct(x2d.shape, x2d.dtype),
        in_specs=[pl.BlockSpec(memory_space=pl.ANY)],
        out_specs=pl.BlockSpec(memory_space=pl.ANY),
        input_output_aliases={0: 0},
    )(x2d)


def _flatten_dma_call(x2d):
    itemsize = jnp.dtype(x2d.dtype).itemsize
    total = x2d.shape[0] * x2d.shape[1]
    return pl.pallas_call(
        _dma_copy_kernel,
        out_shape=jax.ShapeDtypeStruct(x2d.shape, x2d.dtype),
        in_specs=[pl.BlockSpec(memory_space=pl.ANY)],
        out_specs=pl.BlockSpec(memory_space=pl.ANY),
        scratch_shapes=[pltpu.SemaphoreType.DMA],
        cost_estimate=pl.CostEstimate(
            flops=0, transcendentals=0, bytes_accessed=2 * total * itemsize),
    )(x2d)


def flatten_forward(x):
    """Pallas equivalent of Flatten.forward: (N, ...) -> (N, prod(rest))."""
    n = x.shape[0]
    f = 1
    for d in x.shape[1:]:
        f *= d

    # Metadata-only row-major collapse (same semantics as torch
    # .contiguous().view(N, -1); JAX arrays are always row-major contiguous).
    x_flat = x.reshape(n, f)

    # Primary path: zero-copy kernel boundary (output aliases input, no DMA).
    # Under jit with a donated input this is fully copy-free; eagerly, XLA
    # inserts at most one protective copy so the caller's array stays valid.
    try:
        return jax.block_until_ready(_flatten_alias_call(x_flat))
    except Exception:
        # Robust fallback: direct HBM->HBM DMA copy.  No tiling, no lane /
        # divisor constraints, handles awkward (non-multiple-of-128) sizes.
        return _flatten_dma_call(x_flat)


if __name__ == "__main__":
    key = jax.random.PRNGKey(0)
    k0, k1 = jax.random.split(key)

    # Conv-style NCHW feature map consistent with the module: (2, 4, 16, 16).
    x = jax.random.normal(k0, (2, 4, 16, 16), dtype=jnp.float32)
    y_ref = x.reshape(x.shape[0], -1)          # reference first (alias safety)
    y = jax.block_until_ready(flatten_forward(x))
    assert y.shape == (2, 4 * 16 * 16), y.shape
    assert y.dtype == x.dtype
    assert bool(jnp.array_equal(y, y_ref))

    # Awkward, non-128-multiple shape: exercises the robustness the previous
    # tiled version lacked (no lane-density / clean-divisor requirements here).
    x2 = jax.random.normal(k1, (3, 5, 7), dtype=jnp.bfloat16)
    y2_ref = x2.reshape(x2.shape[0], -1)
    y2 = jax.block_until_ready(flatten_forward(x2))
    assert y2.shape == (3, 35), y2.shape
    assert y2.dtype == x2.dtype
    assert bool(jnp.array_equal(y2, y2_ref))

    print("KERNEL_OK")
</pallas_src>

<mosaic_0001>
module attributes {stable_mosaic.version = 11 : i64} {
  func.func @_alias_touch_kernel(%arg0: memref<2x1024xf32, #tpu.memory_space<any>>, %arg1: memref<2x1024xf32, #tpu.memory_space<any>>) attributes {dimension_semantics = [], scalar_prefetch = 0 : i64, scratch_operands = 0 : i64, tpu.core_type = #tpu.core_type<tc>} {
    return
  }
}

module attributes {stable_mosaic.version = 11 : i64} {
  func.func @_dma_copy_kernel(%arg0: memref<2x1024xf32, #tpu.memory_space<any>>, %arg1: memref<2x1024xf32, #tpu.memory_space<any>>, %arg2: memref<!tpu.dma_semaphore, #tpu.memory_space<semaphore_mem>>) attributes {dimension_semantics = [], scalar_prefetch = 0 : i64, scratch_operands = 1 : i64, tpu.core_type = #tpu.core_type<tc>} {
    tpu.enqueue_dma source(%arg0 : memref<2x1024xf32, #tpu.memory_space<any>>) target(%arg1 : memref<2x1024xf32, #tpu.memory_space<any>>) target_semaphore(%arg2 : memref<!tpu.dma_semaphore, #tpu.memory_space<semaphore_mem>>)
    tpu.wait_dma2 semaphore(%arg2 : memref<!tpu.dma_semaphore, #tpu.memory_space<semaphore_mem>>) src(%arg0 : memref<2x1024xf32, #tpu.memory_space<any>>) dst(%arg1 : memref<2x1024xf32, #tpu.memory_space<any>>)
    return
  }
}

</mosaic_0001>

<bundles_post_ra>
// kernel: tpu_custom_call.1
= control target key start
LH: loop header
LB: loop body
LE: loop exit
PB: predicated region body
PF: predicated region fallthrough
CT: control target
= control target key end

     0   :  { %s16_s0 = inlined_call_operand.hbm [shape: f32[2,1024], index: 0, kind: input, shape index: {}, may-alias: {0,1}]   ;;  %s17_s1 = inlined_call_operand.hbm [shape: f32[2,1024], index: 1, kind: output, shape index: {}, may-alias: {0,1}]  }

// kernel: tpu_custom_call.1
= control target key start
LH: loop header
LB: loop body
LE: loop exit
PB: predicated region body
PF: predicated region fallthrough
CT: control target
= control target key end

     0   :  { %s35_s6 = smov [#allocation2]   ;;  %s36_s7 = smov [#allocation3]   ;;  %s54_s0 = inlined_call_operand.hbm [shape: f32[2,1024], index: 0, kind: input, shape index: {}]   ;;  %s55_s1 = inlined_call_operand.hbm [shape: f32[2,1024], index: 1, kind: output, shape index: {}]  }
   0x1   :  { %s37_s8 = smov 0  }
   0x2   :  { %18 = dma.general %s54_s0, 256, %s55_s1, %s35_s6, %s36_s7, [#allocation4], %s37_s8, 0  }
   0x3   :  { %33 = dma.done.wait [#allocation2], 256 }
   0x4   :  { %34 = vsyncadd [#allocation2], 4294967040 }
   0x5   :  { %23 = vsyncmov [#allocation2] }
   0x8   :  { %s24_s13 = vpop.sfrf %23 }
   0x9   :  { %p29_p0 = scmp.ne.s32.totalorder %s24_s13, 0 }
   0xb   :  { %28 = shalt.err (%p29_p0)  }

</bundles_post_ra>
